<compile_context>
chip_gen: v7x
topology: tpu7x:2x2x1
jax: 0.10.0
libtpu: 0.0.40
codegen_flags: <defaults>
</compile_context>

<pallas_src>
import functools
import numpy as np
import jax
import jax.numpy as jnp
from jax import lax
from jax.experimental import pallas as pl
from jax.experimental.pallas import tpu as pltpu


# ----------------------- resampling matrices (host-side, numpy) -----------------------

def bilinear_matrix(out_size, in_size):
    """Row-interpolation matrix for F.interpolate(mode='bilinear', align_corners=True)."""
    M = np.zeros((out_size, in_size), dtype=np.float32)
    if out_size == 1:
        M[0, 0] = 1.0
        return M
    for i in range(out_size):
        s = i * (in_size - 1) / (out_size - 1)
        i0 = min(int(np.floor(s)), in_size - 1)
        i1 = min(i0 + 1, in_size - 1)
        f = s - i0
        M[i, i0] += 1.0 - f
        M[i, i1] += f
    return M


def adaptive_pool_matrix(out_size, in_size):
    """Averaging matrix equivalent to nn.AdaptiveAvgPool2d along one axis."""
    M = np.zeros((out_size, in_size), dtype=np.float32)
    for p in range(out_size):
        start = int(np.floor(p * in_size / out_size))
        end = int(np.ceil((p + 1) * in_size / out_size))
        M[p, start:end] = 1.0 / (end - start)
    return M


def window_offsets(dilations):
    """Row-window offsets (into d_max-padded rows) in the fixed slot order used by
    both the host-built stacked input and the folded weight matrix:
      slot 0: center tap (shared by all dilated branches + 1x1 + gave_pool),
      slots 1+2i / 2+2i: ky=0 / ky=2 taps of dilated branch i."""
    dm = max(dilations)
    offs = (dm,)
    for d in dilations:
        offs += (dm - d, dm + d)
    return offs


# --------------------------------- fused Pallas kernel ---------------------------------

def _aspp_fused_kernel(xs_ref, wbig_ref, gw_ref, ahb_ref, shcat_ref,
                       lhb_ref, rw_ref, bord_ref, out_ref, *, krow, neg_slope):
    """One grid step = Nb batch elements of the full ASPP block.

    xs_ref   : (1, M, 7*Krow)  bf16  batch-stacked row windows (M = Nb*H), slot 0 = interior
    wbig_ref : (7*Krow, L)     bf16  all dilated taps + 1x1, BN-scale folded AND folded
                                      through the catdown 1x1 (+BN scale)
    gw_ref   : (Krow, L)       bf16  gave_pool: poolW + 1x1 conv + upW + catdown folded
    ahb_ref  : (M, M)          bf16  gave_pool poolH + upH (Uh@Ph), block-diag per batch
    shcat_ref: (1, L)          f32   catdown shift (all branch BN shifts folded through)
    lhb_ref  : (Mout, M)       bf16  final H-upsample interior weights, block-diag per batch
    rw_ref   : (L, Lout)       bf16  final W-upsample interior weights (per-channel)
    bord_ref : (Mout, Lout)    f32   final-upsample contribution of the pad=1 border
    out_ref  : (1, Mout, Lout) f32
    """
    f32, bf16 = jnp.float32, jnp.bfloat16
    xs = xs_ref[0]                           # (M, 7*Krow) bf16
    xin = xs[:, :krow]                       # interior window (M, Krow), prefix lane slice

    # 3 dilated 3x3 branches + 1x1 branch, folded through catdown: ONE long-K matmul.
    z = jnp.dot(xs, wbig_ref[...], preferred_element_type=f32)              # (M, L)

    # gave_pool branch (pool/conv/up along W folded into gw; pool/up along H = ahb row-mix),
    # also folded through catdown.
    g = jnp.dot(xin, gw_ref[...], preferred_element_type=f32)               # (M, L)
    z = z + jnp.dot(ahb_ref[...], g.astype(bf16), preferred_element_type=f32)

    # catdown BN shift (branch BN shifts folded through) + LeakyReLU(0.1)
    z = z + shcat_ref[...]
    z = jnp.where(z >= 0, z, z * neg_slope)
    # TODO(synk): Dropout2d(p=0.25) is identity under eval/inference semantics.

    # final bilinear upsample (align_corners=True) of the pad=1 catdown output:
    # interior contribution + precomputed constant border plane.
    zr = jnp.dot(z.astype(bf16), rw_ref[...], preferred_element_type=f32)   # (M, Lout)
    out = jnp.dot(lhb_ref[...], zr.astype(bf16), preferred_element_type=f32)  # (Mout, Lout)
    out_ref[0] = (out + bord_ref[...]).astype(out_ref.dtype)


def aspp_forward_pallas(x_nchw, kp, *, dilations=(4, 8, 12), neg_slope=0.1):
    """Public wrapper: NCHW in -> NCHW out, full ASPP block in one pallas_call."""
    N, Cin, H, W = x_nchw.shape
    dm = max(dilations)
    Hpad, Wpad = H + 2 * dm, W + 2 * dm
    Krow = Wpad * Cin
    offs = window_offsets(dilations)
    T = len(offs)
    Ktot = T * Krow

    L = kp["shcat"].shape[1]                  # W * Cout
    Cout = L // W
    M = kp["ahb"].shape[0]                    # Nb * H
    Nb = M // H
    Mout = kp["lhb"].shape[0]                 # Nb * OH
    Lout = kp["rw"].shape[1]                  # OW * Cout
    assert N % Nb == 0, (N, Nb)
    G = N // Nb

    # layout plumbing (host): pad ONCE with d_max, flatten (W, Cin) into the lane axis,
    # gather the 7 row windows along K, stack Nb batch elements along M.
    x_nhwc = jnp.transpose(x_nchw.astype(jnp.float32), (0, 2, 3, 1))
    x_pad = jnp.pad(x_nhwc, ((0, 0), (dm, dm), (dm, dm), (0, 0))).reshape(N, Hpad, Krow)
    wins = jnp.concatenate([x_pad[:, o:o + H, :] for o in offs], axis=-1)   # (N, H, Ktot)
    xs = wins.reshape(G, M, Ktot).astype(jnp.bfloat16)

    kern = functools.partial(_aspp_fused_kernel, krow=Krow, neg_slope=neg_slope)

    flops = 2 * G * (M * Ktot * L + M * Krow * L + M * M * L
                     + M * L * Lout + Mout * M * Lout)
    bytes_accessed = (xs.size * 2 + kp["wbig"].size * 2 + kp["gw"].size * 2
                      + kp["ahb"].size * 2 + kp["shcat"].size * 4 + kp["lhb"].size * 2
                      + kp["rw"].size * 2 + kp["bord"].size * 4 + G * Mout * Lout * 4)

    out_row = pl.pallas_call(
        kern,
        out_shape=jax.ShapeDtypeStruct((G, Mout, Lout), jnp.float32),
        grid=(G,),
        in_specs=[
            pl.BlockSpec((1, M, Ktot), lambda g: (g, 0, 0)),   # xs
            pl.BlockSpec((Ktot, L), lambda g: (0, 0)),         # wbig
            pl.BlockSpec((Krow, L), lambda g: (0, 0)),         # gw
            pl.BlockSpec((M, M), lambda g: (0, 0)),            # ahb
            pl.BlockSpec((1, L), lambda g: (0, 0)),            # shcat
            pl.BlockSpec((Mout, M), lambda g: (0, 0)),         # lhb
            pl.BlockSpec((L, Lout), lambda g: (0, 0)),         # rw
            pl.BlockSpec((Mout, Lout), lambda g: (0, 0)),      # bord
        ],
        out_specs=pl.BlockSpec((1, Mout, Lout), lambda g: (g, 0, 0)),
        compiler_params=pltpu.CompilerParams(dimension_semantics=("parallel",)),
        cost_estimate=pl.CostEstimate(flops=flops, transcendentals=0,
                                      bytes_accessed=bytes_accessed),
    )(xs, kp["wbig"], kp["gw"], kp["ahb"], kp["shcat"], kp["lhb"], kp["rw"], kp["bord"])

    # (G, Nb*OH, OW*Cout) -> NCHW
    OH = Mout // Nb
    OW = Lout // Cout
    out = out_row.reshape(N, OH, OW, Cout)
    return jnp.transpose(out, (0, 3, 1, 2))


# ----------------------------- parameters & host-side folding -----------------------------

def init_raw_params(key, in_chs, out_chs):
    """Random parameters in PyTorch layout (conv weights + frozen BN stats)."""
    keys = jax.random.split(key, 12)

    def bn_affine(k, ch):
        kg, kb, km, kv = jax.random.split(k, 4)
        gamma = 1.0 + 0.1 * jax.random.normal(kg, (ch,), jnp.float32)
        beta = 0.1 * jax.random.normal(kb, (ch,), jnp.float32)
        mean = 0.1 * jax.random.normal(km, (ch,), jnp.float32)
        var = jax.random.uniform(kv, (ch,), jnp.float32, 0.5, 1.5)
        scale = gamma / jnp.sqrt(var + 1e-5)
        shift = beta - mean * scale
        return scale, shift

    p = {}
    for i in range(3):
        p[f"w_b{i + 1}"] = 0.1 * jax.random.normal(keys[i], (out_chs, in_chs, 3, 3), jnp.float32)
        p[f"scale_b{i + 1}"], p[f"shift_b{i + 1}"] = bn_affine(keys[3 + i], out_chs)
    p["w_1x1"] = 0.1 * jax.random.normal(keys[6], (out_chs, in_chs), jnp.float32)
    p["scale_1x1"], p["shift_1x1"] = bn_affine(keys[7], out_chs)
    p["w_g"] = 0.1 * jax.random.normal(keys[8], (out_chs, in_chs), jnp.float32)
    p["scale_g"], p["shift_g"] = bn_affine(keys[9], out_chs)
    p["w_cd"] = 0.1 * jax.random.normal(keys[10], (out_chs, 5 * out_chs), jnp.float32)
    p["scale_cd"], p["shift_cd"] = bn_affine(keys[11], out_chs)
    # NOTE: all convs in the reference module have bias=False; no conv biases exist.
    return p


def build_resample_mats(H, W, up_ratio):
    OH, OW = int(H * up_ratio), int(W * up_ratio)
    return dict(
        Ph=jnp.asarray(adaptive_pool_matrix(3, H)),
        Pw=jnp.asarray(adaptive_pool_matrix(3, W)),
        Uh=jnp.asarray(bilinear_matrix(H, 3)),
        Uw=jnp.asarray(bilinear_matrix(W, 3)),
        Uh2=jnp.asarray(bilinear_matrix(OH, H + 2)),
        Uw2=jnp.asarray(bilinear_matrix(OW, W + 2)),
    )


def fold_params(raw, mats, *, in_chs, out_chs, H, W, dilations, neg_slope, up_ratio,
                batch_block):
    """Fold BN into weights, fold every branch through the catdown 1x1, and build the
    bf16 matmul operands used by the kernel."""
    Cin, Cout = in_chs, out_chs
    dm = max(dilations)
    Wpad = W + 2 * dm
    Krow, L = Wpad * Cin, W * Cout
    OH, OW = int(H * up_ratio), int(W * up_ratio)
    Lout = OW * Cout
    Nb = batch_block
    npf = lambda a: np.asarray(a, dtype=np.float32)
    Ph, Pw, Uh, Uw, Uh2, Uw2 = (npf(mats[k]) for k in ("Ph", "Pw", "Uh", "Uw", "Uh2", "Uw2"))

    # per-pixel block-diagonal catdown 1x1 (+BN scale), one (L, L) per concat slot
    # concat order in the module: (b1, g, b2, c1, b3) -> slots 0..4
    wcd_eff = npf(raw["w_cd"]) * npf(raw["scale_cd"])[:, None]          # (Cout, 5*Cout)
    dcatB = np.zeros((5, W, Cout, W, Cout), np.float32)
    for b in range(5):
        blk = wcd_eff[:, b * Cout:(b + 1) * Cout].T                     # (Cout_in, Cout_out)
        for w in range(W):
            dcatB[b, w, :, w, :] = blk
    dcatB = dcatB.reshape(5, L, L)

    # banded (Wpad*Cin -> W*Cout) matrices per (branch, ky) with BN scale folded
    def banded_3x3(w_conv, scale, d):
        w_eff = npf(w_conv) * npf(scale)[:, None, None, None]           # (Cout, Cin, 3, 3)
        out = np.zeros((3, Wpad, Cin, W, Cout), np.float32)
        for ky in range(3):
            for kx in range(3):
                wk = w_eff[:, :, ky, kx].T                              # (Cin, Cout)
                for w in range(W):
                    out[ky, dm - d + kx * d + w, :, w, :] += wk
        return out.reshape(3, Krow, L)

    bband = [banded_3x3(raw[f"w_b{i + 1}"], raw[f"scale_b{i + 1}"], d)
             for i, d in enumerate(dilations)]

    # 1x1 branch banded
    c1band = np.zeros((Wpad, Cin, W, Cout), np.float32)
    w1_eff = (npf(raw["w_1x1"]) * npf(raw["scale_1x1"])[:, None]).T
    for w in range(W):
        c1band[dm + w, :, w, :] = w1_eff
    c1band = c1band.reshape(Krow, L)

    # gave_pool: poolW + 1x1 conv + upW folded along W/channels; poolH + upH = AhPh rows
    AhPh = Uh @ Ph                                                      # (H, H)
    AwPw = Uw @ Pw                                                      # (W, W)
    wg_eff = (npf(raw["w_g"]) * npf(raw["scale_g"])[:, None]).T         # (Cin, Cout)
    gband = np.zeros((Wpad, Cin, W, Cout), np.float32)
    for j in range(W):
        gband[dm + j] = wg_eff[:, None, :] * AwPw[:, j][None, :, None]
    gband = gband.reshape(Krow, L)

    # fold each branch THROUGH the catdown 1x1 so the catdown matmul disappears.
    # slot order must match window_offsets(): center first, then (ky=0, ky=2) per branch.
    cat_slot = (0, 2, 4)                                                # b1, b2, b3 concat slots
    w_center = (bband[0][1] @ dcatB[0] + bband[1][1] @ dcatB[2]
                + bband[2][1] @ dcatB[4] + c1band @ dcatB[3])
    slot_mats = [w_center]
    for i in range(3):
        slot_mats.append(bband[i][0] @ dcatB[cat_slot[i]])
        slot_mats.append(bband[i][2] @ dcatB[cat_slot[i]])
    wbig = np.concatenate(slot_mats, axis=0)                            # (7*Krow, L)
    gw = gband @ dcatB[1]                                               # (Krow, L)

    # branch BN shifts folded through the catdown conv + catdown BN shift (interior pixels)
    t_concat = np.concatenate([npf(raw["shift_b1"]), npf(raw["shift_g"]),
                               npf(raw["shift_b2"]), npf(raw["shift_1x1"]),
                               npf(raw["shift_b3"])])
    sh_total = npf(raw["shift_cd"]) + npf(raw["scale_cd"]) * (npf(raw["w_cd"]) @ t_concat)
    shcat = np.tile(sh_total, W)[None, :]                               # (1, L)

    # block-diagonal per-batch row-mixers (gave_pool AhPh; final H-upsample interior rows)
    lh = Uh2[:, 1:H + 1]                                                # (OH, H)
    ahb = np.zeros((Nb * H, Nb * H), np.float32)
    lhb = np.zeros((Nb * OH, Nb * H), np.float32)
    for nb in range(Nb):
        ahb[nb * H:(nb + 1) * H, nb * H:(nb + 1) * H] = AhPh
        lhb[nb * OH:(nb + 1) * OH, nb * H:(nb + 1) * H] = lh

    # per-channel W-upsample of the interior
    rw = np.zeros((W, Cout, OW, Cout), np.float32)
    uw_in = Uw2[:, 1:W + 1].T                                           # (W, OW)
    for co in range(Cout):
        rw[:, co, :, co] = uw_in
    rw = rw.reshape(L, Lout)

    # pad=1 catdown border (= LeakyReLU(shift_cd)) upsampled, tiled per batch row-block
    E = np.ones((H + 2, W + 2), np.float32)
    E[1:H + 1, 1:W + 1] = 0.0
    e_up = Uh2 @ E @ Uw2.T                                              # (OH, OW)
    t_cd = npf(raw["shift_cd"])
    border = np.where(t_cd >= 0, t_cd, t_cd * neg_slope)                # (Cout,)
    bord = (e_up[:, :, None] * border[None, None, :]).reshape(OH, Lout)
    bordb = np.tile(bord, (Nb, 1))                                      # (Nb*OH, Lout)

    bf = jnp.bfloat16
    return dict(
        wbig=jnp.asarray(wbig, bf), gw=jnp.asarray(gw, bf), ahb=jnp.asarray(ahb, bf),
        shcat=jnp.asarray(shcat, jnp.float32), lhb=jnp.asarray(lhb, bf),
        rw=jnp.asarray(rw, bf), bord=jnp.asarray(bordb, jnp.float32))


# ------------------------------- pure-JAX reference (XLA) -------------------------------

def aspp_reference(x_nchw, raw, mats, *, dilations, neg_slope):
    Ph, Pw, Uh, Uw, Uh2, Uw2 = (mats[k] for k in ("Ph", "Pw", "Uh", "Uw", "Uh2", "Uw2"))
    hi = lax.Precision.HIGHEST
    x = x_nchw.astype(jnp.float32)

    def conv2d(inp, w, dilation, padding):
        return lax.conv_general_dilated(
            inp, w, window_strides=(1, 1),
            padding=((padding, padding), (padding, padding)),
            rhs_dilation=(dilation, dilation),
            dimension_numbers=("NCHW", "OIHW", "NCHW"), precision=hi)

    def bn(y, scale, shift):
        return y * scale[None, :, None, None] + shift[None, :, None, None]

    b1 = bn(conv2d(x, raw["w_b1"], dilations[0], dilations[0]), raw["scale_b1"], raw["shift_b1"])
    b2 = bn(conv2d(x, raw["w_b2"], dilations[1], dilations[1]), raw["scale_b2"], raw["shift_b2"])
    b3 = bn(conv2d(x, raw["w_b3"], dilations[2], dilations[2]), raw["scale_b3"], raw["shift_b3"])
    c1 = bn(conv2d(x, raw["w_1x1"][:, :, None, None], 1, 0), raw["scale_1x1"], raw["shift_1x1"])

    pooled = jnp.einsum("ph,nchw->ncpw", Ph, x, precision=hi)
    pooled = jnp.einsum("qw,ncpw->ncpq", Pw, pooled, precision=hi)
    g = bn(conv2d(pooled, raw["w_g"][:, :, None, None], 1, 0), raw["scale_g"], raw["shift_g"])
    g = jnp.einsum("hp,ncpq->nchq", Uh, g, precision=hi)
    g = jnp.einsum("wq,nchq->nchw", Uw, g, precision=hi)

    cat = jnp.concatenate([b1, g, b2, c1, b3], axis=1)
    y = bn(conv2d(cat, raw["w_cd"][:, :, None, None], 1, 1), raw["scale_cd"], raw["shift_cd"])
    y = jnp.where(y >= 0, y, y * neg_slope)          # LeakyReLU; Dropout2d identity (eval)

    out = jnp.einsum("oa,ncab->ncob", Uh2, y, precision=hi)
    out = jnp.einsum("pb,ncob->ncop", Uw2, out, precision=hi)
    return out


# --------------------------------------- main ---------------------------------------

if __name__ == "__main__":
    key = jax.random.PRNGKey(0)
    kx, kprm = jax.random.split(key)

    N, in_chs, out_chs, H, W = 2, 4, 8, 16, 16
    up_ratio, dilations, neg_slope = 2, (4, 8, 12), 0.1
    batch_block = 2                       # batch elements stacked along M per grid step

    x = jax.random.normal(kx, (N, in_chs, H, W), jnp.float32)
    raw = init_raw_params(kprm, in_chs, out_chs)
    mats = build_resample_mats(H, W, up_ratio)
    kparams = fold_params(raw, mats, in_chs=in_chs, out_chs=out_chs, H=H, W=W,
                          dilations=dilations, neg_slope=neg_slope, up_ratio=up_ratio,
                          batch_block=batch_block)

    fwd = jax.jit(functools.partial(aspp_forward_pallas, dilations=dilations,
                                    neg_slope=neg_slope))
    out = jax.block_until_ready(fwd(x, kparams))

    OH, OW = int(H * up_ratio), int(W * up_ratio)
    assert out.shape == (N, out_chs, OH, OW), out.shape
    assert bool(jnp.all(jnp.isfinite(out)))

    ref = aspp_reference(x, raw, mats, dilations=dilations, neg_slope=neg_slope)
    err = float(jnp.max(jnp.abs(out - ref)))
    assert err < 2e-2, f"kernel/reference mismatch: max abs err {err}"

    print("KERNEL_OK")
</pallas_src>

<mosaic_0001>
module attributes {stable_mosaic.version = 11 : i64} {
  func.func @_aspp_fused_kernel(%arg0: i32, %arg1: memref<1x32x1120xbf16, #tpu.memory_space<vmem>>, %arg2: memref<1120x128xbf16, #tpu.memory_space<vmem>>, %arg3: memref<160x128xbf16, #tpu.memory_space<vmem>>, %arg4: memref<32x32xbf16, #tpu.memory_space<vmem>>, %arg5: memref<1x128xf32, #tpu.memory_space<vmem>>, %arg6: memref<64x32xbf16, #tpu.memory_space<vmem>>, %arg7: memref<128x256xbf16, #tpu.memory_space<vmem>>, %arg8: memref<64x256xf32, #tpu.memory_space<vmem>>, %arg9: memref<1x64x256xf32, #tpu.memory_space<vmem>>) attributes {dimension_semantics = [#tpu.dimension_semantics<parallel>], iteration_bounds = array<i64: 1>, scalar_prefetch = 0 : i64, scratch_operands = 0 : i64, tpu.core_type = #tpu.core_type<tc>, window_params = [{transform_indices = @transform_0, window_bounds = array<i64: 1, 32, 1120>}, {pipeline_mode = #tpu.pipeline_mode<synchronous>, transform_indices = @transform_1, window_bounds = array<i64: 1120, 128>}, {pipeline_mode = #tpu.pipeline_mode<synchronous>, transform_indices = @transform_2, window_bounds = array<i64: 160, 128>}, {pipeline_mode = #tpu.pipeline_mode<synchronous>, transform_indices = @transform_3, window_bounds = array<i64: 32, 32>}, {pipeline_mode = #tpu.pipeline_mode<synchronous>, transform_indices = @transform_4, window_bounds = array<i64: 1, 128>}, {pipeline_mode = #tpu.pipeline_mode<synchronous>, transform_indices = @transform_5, window_bounds = array<i64: 64, 32>}, {pipeline_mode = #tpu.pipeline_mode<synchronous>, transform_indices = @transform_6, window_bounds = array<i64: 128, 256>}, {pipeline_mode = #tpu.pipeline_mode<synchronous>, transform_indices = @transform_7, window_bounds = array<i64: 64, 256>}, {transform_indices = @transform_8, window_bounds = array<i64: 1, 64, 256>}]} {
    %c0 = arith.constant 0 : index
    %c0_0 = arith.constant 0 : index
    %c0_1 = arith.constant 0 : index
    %0 = vector.load %arg1[%c0, %c0_0, %c0_1] : memref<1x32x1120xbf16, #tpu.memory_space<vmem>>, vector<1x32x1120xbf16>
    %1 = vector.shape_cast %0 : vector<1x32x1120xbf16> to vector<32x1120xbf16>
    %2 = vector.extract_strided_slice %1 {offsets = [0, 0], sizes = [32, 160], strides = [1, 1]} : vector<32x1120xbf16> to vector<32x160xbf16>
    %c0_2 = arith.constant 0 : index
    %c0_3 = arith.constant 0 : index
    %3 = vector.load %arg2[%c0_2, %c0_3] : memref<1120x128xbf16, #tpu.memory_space<vmem>>, vector<1120x128xbf16>
    %cst = arith.constant dense<0.000000e+00> : vector<32x128xf32>
    %4 = tpu.matmul %1, %3, %cst {dimension_numbers = #tpu.dot_dimension_numbers<[1], [0], [0], [1], [0, 0, 1, 1], [], []>} : vector<32x1120xbf16>, vector<1120x128xbf16>, vector<32x128xf32> -> vector<32x128xf32>
    %c0_4 = arith.constant 0 : index
    %c0_5 = arith.constant 0 : index
    %5 = vector.load %arg3[%c0_4, %c0_5] : memref<160x128xbf16, #tpu.memory_space<vmem>>, vector<160x128xbf16>
    %cst_6 = arith.constant dense<0.000000e+00> : vector<32x128xf32>
    %6 = tpu.matmul %2, %5, %cst_6 {dimension_numbers = #tpu.dot_dimension_numbers<[1], [0], [0], [1], [0, 0, 1, 1], [], []>} : vector<32x160xbf16>, vector<160x128xbf16>, vector<32x128xf32> -> vector<32x128xf32>
    %c0_7 = arith.constant 0 : index
    %c0_8 = arith.constant 0 : index
    %7 = vector.load %arg4[%c0_7, %c0_8] : memref<32x32xbf16, #tpu.memory_space<vmem>>, vector<32x32xbf16>
    %8 = arith.truncf %6 : vector<32x128xf32> to vector<32x128xbf16>
    %cst_9 = arith.constant dense<0.000000e+00> : vector<32x128xf32>
    %9 = tpu.matmul %7, %8, %cst_9 {dimension_numbers = #tpu.dot_dimension_numbers<[1], [0], [0], [1], [0, 0, 1, 1], [], []>} : vector<32x32xbf16>, vector<32x128xbf16>, vector<32x128xf32> -> vector<32x128xf32>
    %10 = arith.addf %4, %9 : vector<32x128xf32>
    %c0_10 = arith.constant 0 : index
    %c0_11 = arith.constant 0 : index
    %11 = vector.load %arg5[%c0_10, %c0_11] : memref<1x128xf32, #tpu.memory_space<vmem>>, vector<1x128xf32>
    %12 = vector.broadcast %11 : vector<1x128xf32> to vector<32x128xf32>
    %13 = arith.addf %10, %12 : vector<32x128xf32>
    %cst_12 = arith.constant 0.000000e+00 : f32
    %14 = vector.broadcast %cst_12 : f32 to vector<32x128xf32>
    %15 = arith.cmpf oge, %13, %14 : vector<32x128xf32>
    %cst_13 = arith.constant 1.000000e-01 : f32
    %16 = vector.broadcast %cst_13 : f32 to vector<32x128xf32>
    %17 = arith.mulf %13, %16 : vector<32x128xf32>
    %18 = arith.select %15, %13, %17 : vector<32x128xi1>, vector<32x128xf32>
    %19 = arith.truncf %18 : vector<32x128xf32> to vector<32x128xbf16>
    %c0_14 = arith.constant 0 : index
    %c0_15 = arith.constant 0 : index
    %20 = vector.load %arg7[%c0_14, %c0_15] : memref<128x256xbf16, #tpu.memory_space<vmem>>, vector<128x256xbf16>
    %cst_16 = arith.constant dense<0.000000e+00> : vector<32x256xf32>
    %21 = tpu.matmul %19, %20, %cst_16 {dimension_numbers = #tpu.dot_dimension_numbers<[1], [0], [0], [1], [0, 0, 1, 1], [], []>} : vector<32x128xbf16>, vector<128x256xbf16>, vector<32x256xf32> -> vector<32x256xf32>
    %c0_17 = arith.constant 0 : index
    %c0_18 = arith.constant 0 : index
    %22 = vector.load %arg6[%c0_17, %c0_18] : memref<64x32xbf16, #tpu.memory_space<vmem>>, vector<64x32xbf16>
    %23 = arith.truncf %21 : vector<32x256xf32> to vector<32x256xbf16>
    %cst_19 = arith.constant dense<0.000000e+00> : vector<64x256xf32>
    %24 = tpu.matmul %22, %23, %cst_19 {dimension_numbers = #tpu.dot_dimension_numbers<[1], [0], [0], [1], [0, 0, 1, 1], [], []>} : vector<64x32xbf16>, vector<32x256xbf16>, vector<64x256xf32> -> vector<64x256xf32>
    %c0_20 = arith.constant 0 : index
    %c0_21 = arith.constant 0 : index
    %25 = vector.load %arg8[%c0_20, %c0_21] : memref<64x256xf32, #tpu.memory_space<vmem>>, vector<64x256xf32>
    %26 = arith.addf %24, %25 : vector<64x256xf32>
    %c0_22 = arith.constant 0 : index
    %c0_23 = arith.constant 0 : index
    %c0_24 = arith.constant 0 : index
    %27 = vector.load %arg9[%c0_22, %c0_23, %c0_24] : memref<1x64x256xf32, #tpu.memory_space<vmem>>, vector<1x64x256xf32>
    %28 = vector.shape_cast %27 : vector<1x64x256xf32> to vector<64x256xf32>
    %29 = vector.shape_cast %26 : vector<64x256xf32> to vector<1x64x256xf32>
    tpu.vector_store %arg9[%c0_22, %c0_23, %c0_24], %29 {strides = array<i32>} : memref<1x64x256xf32, #tpu.memory_space<vmem>>, vector<1x64x256xf32>,
    return
  }
  func.func @transform_0(%arg0: i32) -> (i32, i32, i32) {
    %c0_i32 = arith.constant 0 : i32
    %c0_i32_0 = arith.constant 0 : i32
    %c0_i32_1 = arith.constant 0 : i32
    return %arg0, %c0_i32, %c0_i32_0 : i32, i32, i32
  }
  func.func @transform_1(%arg0: i32) -> (i32, i32) {
    %c0_i32 = arith.constant 0 : i32
    %c0_i32_0 = arith.constant 0 : i32
    %c0_i32_1 = arith.constant 0 : i32
    return %c0_i32, %c0_i32_0 : i32, i32
  }
  func.func @transform_2(%arg0: i32) -> (i32, i32) {
    %c0_i32 = arith.constant 0 : i32
    %c0_i32_0 = arith.constant 0 : i32
    %c0_i32_1 = arith.constant 0 : i32
    return %c0_i32, %c0_i32_0 : i32, i32
  }
  func.func @transform_3(%arg0: i32) -> (i32, i32) {
    %c0_i32 = arith.constant 0 : i32
    %c0_i32_0 = arith.constant 0 : i32
    %c0_i32_1 = arith.constant 0 : i32
    return %c0_i32, %c0_i32_0 : i32, i32
  }
  func.func @transform_4(%arg0: i32) -> (i32, i32) {
    %c0_i32 = arith.constant 0 : i32
    %c0_i32_0 = arith.constant 0 : i32
    %c0_i32_1 = arith.constant 0 : i32
    return %c0_i32, %c0_i32_0 : i32, i32
  }
  func.func @transform_5(%arg0: i32) -> (i32, i32) {
    %c0_i32 = arith.constant 0 : i32
    %c0_i32_0 = arith.constant 0 : i32
    %c0_i32_1 = arith.constant 0 : i32
    return %c0_i32, %c0_i32_0 : i32, i32
  }
  func.func @transform_6(%arg0: i32) -> (i32, i32) {
    %c0_i32 = arith.constant 0 : i32
    %c0_i32_0 = arith.constant 0 : i32
    %c0_i32_1 = arith.constant 0 : i32
    return %c0_i32, %c0_i32_0 : i32, i32
  }
  func.func @transform_7(%arg0: i32) -> (i32, i32) {
    %c0_i32 = arith.constant 0 : i32
    %c0_i32_0 = arith.constant 0 : i32
    %c0_i32_1 = arith.constant 0 : i32
    return %c0_i32, %c0_i32_0 : i32, i32
  }
  func.func @transform_8(%arg0: i32) -> (i32, i32, i32) {
    %c0_i32 = arith.constant 0 : i32
    %c0_i32_0 = arith.constant 0 : i32
    %c0_i32_1 = arith.constant 0 : i32
    return %arg0, %c0_i32, %c0_i32_0 : i32, i32, i32
  }
}

</mosaic_0001>

<bundles_post_ra>
// kernel: aspp_forward_pallas.1
= control target key start
LH: loop header
LB: loop body
LE: loop exit
PB: predicated region body
PF: predicated region fallthrough
CT: control target
= control target key end

     0   :  { %v1922_v0 = vmov 0   ;;  %vm288_vm0 = vcmask 261120   ;;  %vm907_vm1 = vcmask 785408   ;;  %s2467_s2 = inlined_call_operand.vmem [shape: bf16[160,128], index: 2, kind: input, shape index: {}]   ;;  %s2468_s0 = inlined_call_operand.vmem [shape: bf16[1,32,1120], index: 0, kind: input, shape index: {}]   ;;  %s2469_s3 = inlined_call_operand.vmem [shape: bf16[32,32], index: 3, kind: input, shape index: {}]   ;;  %s2470_s1 = inlined_call_operand.vmem [shape: bf16[1120,128], index: 1, kind: input, shape index: {}]   ;;  %s2471_s6 = inlined_call_operand.vmem [shape: bf16[128,256], index: 6, kind: input, shape index: {}]   ;;  %s2472_s4 = inlined_call_operand.vmem [shape: f32[1,128], index: 4, kind: input, shape index: {}]   ;;  %s2473_s5 = inlined_call_operand.vmem [shape: bf16[64,32], index: 5, kind: input, shape index: {}]   ;;  %s2474_s7 = inlined_call_operand.vmem [shape: f32[64,256], index: 7, kind: input, shape index: {}]   ;;  %s2475_s8 = inlined_call_operand.vmem [shape: f32[1,64,256], index: 8, kind: output, shape index: {}]  }
   0x1   :  { %295 = vmatprep.subr.bf16.mxu0 %v1922_v0  ;;  %v1786_v1 = vld [vmem:[%s2467_s2] sm:$0xff]   ;;  %v1787_v2 = vld [vmem:[%s2467_s2 + $0x8] sm:$0xff]   ;;  %v1788_v3 = vld [vmem:[%s2467_s2 + $0x10] sm:$0xff]  }
   0x2   :  { %296 = vmatpush1.bf16.msra.mxu0 %v1786_v1  ;;  %v1789_v4 = vld [vmem:[%s2467_s2 + $0x18] sm:$0xff]   ;;  %v1987_v5 = vld [vmem:[%s2468_s0 + $0x4] ss:$36 sps:$4 sm:$0xff]   ;;  %v1792_v8 = vld [vmem:[%s2467_s2 + $0x30] sm:$0xff]  }
   0x3   :  { %297 = vmatprep.subr.bf16.mxu0 %v1922_v0  ;;  %v1790_v6 = vld [vmem:[%s2467_s2 + $0x20] sm:$0xff]   ;;  %1500 = vmatprep.mubr.msk.bf16.mxu0 %vm288_vm0, %v1987_v5  ;;  %v1791_v7 = vld [vmem:[%s2467_s2 + $0x28] sm:$0xff]   ;;  %v1793_v9 = vld [vmem:[%s2467_s2 + $0x38] sm:$0xff]  }
   0x4   :  { %v1794_v10 = vld [vmem:[%s2467_s2 + $0x40] sm:$0xff]   ;;  %v1795_v11 = vld [vmem:[%s2467_s2 + $0x48] sm:$0xff]   ;;  %v1813_v20 = vld [vmem:[%s2470_s1 + $0xd0] sm:$0xff]  }
   0x5   :  { %v2018_v12 = vld [vmem:[%s2468_s0] ss:$36 sps:$4 sm:$0xff]   ;;  %v2023_v13 = vld [vmem:[%s2468_s0 + $0x4c] ss:$36 sps:$4 sm:$0xff]   ;;  %v1817_v22 = vld [vmem:[%s2470_s1 + $0xd8] sm:$0xff]  }
   0x6   :  { %298 = vmatpush1.bf16.msra.mxu0 %v1787_v2  ;;  %v2031_v14 = vld [vmem:[%s2468_s0 + $0x48] ss:$36 sps:$4 sm:$0xff]   ;;  %v1802_v15 = vld [vmem:[%s2469_s3] sm:$0xff]   ;;  %v1815_v21 = vld [vmem:[%s2470_s1 + $0x90] sm:$0xff]  }
   0x7   :  { %299 = vmatprep.subr.bf16.mxu0 %v1922_v0  ;;  %1745 = vmatprep.mubr.msk.bf16.mxu1 %vm288_vm0, %v1802_v15  ;;  %v1804_v16 = vld [vmem:[%s2470_s1 + $0xc0] sm:$0xff]   ;;  %v1809_v18 = vld [vmem:[%s2470_s1 + $0xc8] sm:$0xff]   ;;  %v1819_v23 = vld [vmem:[%s2470_s1 + $0x98] sm:$0xff]  }
   0x8   :  { %v1807_v17 = vld [vmem:[%s2470_s1 + $0x80] sm:$0xff]   ;;  %v1811_v19 = vld [vmem:[%s2470_s1 + $0x88] sm:$0xff]   ;;  %v1829_v28 = vld [vmem:[%s2470_s1 + $0xf0] sm:$0xff]  }
   0x9   :  { %v1821_v24 = vld [vmem:[%s2470_s1 + $0xe0] sm:$0xff]   ;;  %v1825_v26 = vld [vmem:[%s2470_s1 + $0xe8] sm:$0xff]   ;;  %v1831_v29 = vld [vmem:[%s2470_s1 + $0xb0] sm:$0xff]  }
   0xa   :  { %300 = vmatpush1.bf16.msra.mxu0 %v1788_v3  ;;  %v1823_v25 = vld [vmem:[%s2470_s1 + $0xa0] sm:$0xff]   ;;  %v1827_v27 = vld [vmem:[%s2470_s1 + $0xa8] sm:$0xff]   ;;  %v1833_v30 = vld [vmem:[%s2470_s1 + $0xf8] sm:$0xff]  }
   0xb   :  { %301 = vmatprep.subr.bf16.mxu0 %v1922_v0  ;;  %v1835_v31 = vld [vmem:[%s2470_s1 + $0xb8] sm:$0xff]   ;;  %v1836_v32 = vld [vmem:[%s2468_s0 + $0x8] ss:$36 sps:$4 sm:$0xff]   ;;  %v1841_v34 = vld [vmem:[%s2470_s1 + $0x1c0] sm:$0xff]  }
   0xc   :  { %v1838_v33 = vld [vmem:[%s2468_s0 + $0xc] ss:$36 sps:$4 sm:$0xff]   ;;  %v1842_v35 = vld [vmem:[%s2470_s1 + $0x180] sm:$0xff]   ;;  %v1853_v40 = vld [vmem:[%s2470_s1 + $0x1d8] sm:$0xff]  }
   0xd   :  { %v1845_v36 = vld [vmem:[%s2470_s1 + $0x1c8] sm:$0xff]   ;;  %v1849_v38 = vld [vmem:[%s2470_s1 + $0x1d0] sm:$0xff]   ;;  %v1854_v41 = vld [vmem:[%s2470_s1 + $0x198] sm:$0xff]  }
   0xe   :  { %302 = vmatpush1.bf16.msra.mxu0 %v1789_v4  ;;  %v1846_v37 = vld [vmem:[%s2470_s1 + $0x188] sm:$0xff]   ;;  %v1850_v39 = vld [vmem:[%s2470_s1 + $0x190] sm:$0xff]   ;;  %v1857_v42 = vld [vmem:[%s2470_s1 + $0x1e0] sm:$0xff]  }
   0xf   :  { %303 = vmatprep.subr.bf16.mxu0 %v1922_v0  ;;  %v1858_v43 = vld [vmem:[%s2470_s1 + $0x1a0] sm:$0xff]   ;;  %v1860_v44 = vld [vmem:[%s2468_s0 + $0x54] ss:$36 sps:$4 sm:$0xff]   ;;  %v1864_v46 = vld [vmem:[%s2470_s1 + $0x1e8] sm:$0xff]  }
  0x10   :  { %v1863_v45 = vld [vmem:[%s2468_s0 + $0x50] ss:$36 sps:$4 sm:$0xff]   ;;  %v1865_v47 = vld [vmem:[%s2470_s1 + $0x1a8] sm:$0xff]   ;;  %v1872_v50 = vld [vmem:[%s2470_s1 + $0x1f8] sm:$0xff]  }
  0x11   :  { %v1868_v48 = vld [vmem:[%s2470_s1 + $0x1f0] sm:$0xff]   ;;  %v1876_v51 = vld [vmem:[%s2470_s1 + $0x1b8] sm:$0xff]   ;;  %v1886_v54 = vld [vmem:[%s2468_s0 + $0x64] ss:$36 sps:$4 sm:$0xff]  }
  0x12   :  { %304 = vmatpush1.bf16.msra.mxu0 %v1790_v6  ;;  %v1869_v49 = vld [vmem:[%s2470_s1 + $0x1b0] sm:$0xff]   ;;  %v1878_v52 = vld [vmem:[%s2468_s0 + $0x18] ss:$36 sps:$4 sm:$0xff]   ;;  %v1888_v55 = vld [vmem:[%s2468_s0 + $0x60] ss:$36 sps:$4 sm:$0xff]  }
  0x13   :  { %305 = vmatprep.subr.bf16.mxu0 %v1922_v0  ;;  %v1880_v53 = vld [vmem:[%s2468_s0 + $0x1c] ss:$36 sps:$4 sm:$0xff]   ;;  %v1805_v4 = vld [vmem:[%s2469_s3 + $0x8] sm:$0xff]  }
  0x14   :  { %v1803_v3 = vld [vmem:[%s2470_s1 + $0x40] sm:$0xff]  }
  0x15   :  { %v1806_v6 = vld [vmem:[%s2470_s1] sm:$0xff]  }
  0x16   :  { %306 = vmatpush1.bf16.msra.mxu0 %v1791_v7  ;;  %v1808_v7 = vld [vmem:[%s2470_s1 + $0x48] sm:$0xff]   ;;  %v1820_v15 = vld [vmem:[%s2470_s1 + $0x60] sm:$0xff]  }
  0x17   :  { %307 = vmatprep.subr.bf16.mxu0 %v1922_v0 }
  0x1a   :  { %308 = vmatpush1.bf16.msra.mxu0 %v1792_v8  ;;  %v1810_v8 = vld [vmem:[%s2470_s1 + $0x8] sm:$0xff]  }
  0x1b   :  { %309 = vmatprep.subr.bf16.mxu0 %v1922_v0 }
  0x1e   :  { %310 = vmatpush1.bf16.msra.mxu0 %v1793_v9  ;;  %v1812_v9 = vld [vmem:[%s2470_s1 + $0x50] sm:$0xff]  }
  0x1f   :  { %311 = vmatprep.subr.bf16.mxu0 %v1922_v0 }
  0x22   :  { %312 = vmatpush1.bf16.msra.mxu0 %v1794_v10  ;;  %v1814_v10 = vld [vmem:[%s2470_s1 + $0x10] sm:$0xff]  }
  0x23   :  { %313 = vmatprep.subr.bf16.mxu0 %v1922_v0 }
  0x26   :  { %314 = vmatpush1.bf16.msra.mxu0 %v1795_v11  ;;  %v1816_v11 = vld [vmem:[%s2470_s1 + $0x58] sm:$0xff]  }
  0x27   :  { %1649 = vmatprep.subr.bf16.mxu0 %v1804_v16  ;;  %v1822_v16 = vld [vmem:[%s2470_s1 + $0x20] sm:$0xff]  }
  0x29   :  { %328 = vmatmul.mubr.bf16.vlgmr.msra.gmra.mrb[0].mxu0 %v2018_v12 }
  0x2a   :  { %1501 = vmatprep.mubr.msk.bf16.mxu0 %vm288_vm0, %v2023_v13  ;;  %1650 = vmatpush3.bf16.msra.mxu0 %v1807_v17  ;;  %v1824_v17 = vld [vmem:[%s2470_s1 + $0x68] sm:$0xff]  }
  0x2b   :  { %1651 = vmatprep.subr.bf16.mxu0 %v1809_v18  ;;  %v1826_v18 = vld [vmem:[%s2470_s1 + $0x28] sm:$0xff]  }
  0x2e   :  { %1652 = vmatpush3.bf16.msra.mxu0 %v1811_v19  ;;  %v1828_v19 = vld [vmem:[%s2470_s1 + $0x70] sm:$0xff]  }
  0x2f   :  { %1653 = vmatprep.subr.bf16.mxu0 %v1813_v20  ;;  %v1830_v20 = vld [vmem:[%s2470_s1 + $0x30] sm:$0xff]  }
  0x31   :  { %336 = vmatmul.mubr.bf16.gmra.mrb[4].mxu0 %v2031_v14 }
  0x32   :  { %1654 = vmatpush3.bf16.msra.mxu0 %v1815_v21  ;;  %995 = vmatprep.mubr.bf16.mxu0 %v1838_v33  ;;  %v1832_v21 = vld [vmem:[%s2470_s1 + $0x78] sm:$0xff]   ;;  %v1866_v33 = vld [vmem:[%s2470_s1 + $0x170] sm:$0xff]  }
  0x33   :  { %1655 = vmatprep.subr.bf16.mxu0 %v1817_v22  ;;  %v1834_v22 = vld [vmem:[%s2470_s1 + $0x38] sm:$0xff]  }
  0x36   :  { %1656 = vmatpush3.bf16.msra.mxu0 %v1819_v23  ;;  %v1839_v23 = vld [vmem:[%s2470_s1 + $0x140] sm:$0xff]  }
  0x37   :  { %1657 = vmatprep.subr.bf16.mxu0 %v1821_v24  ;;  %v1840_v24 = vld [vmem:[%s2470_s1 + $0x100] sm:$0xff]  }
  0x3a   :  { %1658 = vmatpush3.bf16.msra.mxu0 %v1823_v25  ;;  %v1843_v25 = vld [vmem:[%s2470_s1 + $0x148] sm:$0xff]  }
  0x3b   :  { %1659 = vmatprep.subr.bf16.mxu0 %v1825_v26  ;;  %v1844_v26 = vld [vmem:[%s2470_s1 + $0x108] sm:$0xff]  }
  0x3e   :  { %1660 = vmatpush3.bf16.msra.mxu0 %v1827_v27  ;;  %v1847_v27 = vld [vmem:[%s2470_s1 + $0x150] sm:$0xff]  }
  0x3f   :  { %1661 = vmatprep.subr.bf16.mxu0 %v1829_v28  ;;  %v1848_v28 = vld [vmem:[%s2470_s1 + $0x110] sm:$0xff]  }
  0x42   :  { %1662 = vmatpush3.bf16.msra.mxu0 %v1831_v29  ;;  %v1851_v29 = vld [vmem:[%s2470_s1 + $0x158] sm:$0xff]  }
  0x43   :  { %1663 = vmatprep.subr.bf16.mxu0 %v1833_v30  ;;  %v1855_v30 = vld [vmem:[%s2470_s1 + $0x160] sm:$0xff]  }
  0x46   :  { %1664 = vmatpush3.bf16.msra.mxu0 %v1835_v31  ;;  %v1856_v31 = vld [vmem:[%s2470_s1 + $0x120] sm:$0xff]  }
  0x47   :  { %1705 = vmatprep.subr.bf16.mxu0 %v1841_v34  ;;  %v1867_v34 = vld [vmem:[%s2470_s1 + $0x130] sm:$0xff]  }
  0x49   :  { %996 = vmatmul.mubr.bf16.vlgmr.msra.gmra.mrb[8].mxu0 %v1836_v32  ;;  %v1862_v32 = vld [vmem:[%s2470_s1 + $0x128] sm:$0xff]  }
  0x4a   :  { %1706 = vmatpush3.bf16.msra.mxu0 %v1842_v35  ;;  %1003 = vmatprep.mubr.bf16.mxu0 %v1860_v44  ;;  %v1870_v35 = vld [vmem:[%s2470_s1 + $0x178] sm:$0xff]  }
  0x4b   :  { %1707 = vmatprep.subr.bf16.mxu0 %v1845_v36  ;;  %v1871_v36 = vld [vmem:[%s2470_s1 + $0x138] sm:$0xff]  }
  0x4c   :  { %v1889_v44 = vld [vmem:[%s2470_s1 + $0x218] sm:$0xff]  }
  0x4e   :  { %1708 = vmatpush3.bf16.msra.mxu0 %v1846_v37  ;;  %v1877_v37 = vld [vmem:[%s2470_s1 + $0x200] sm:$0xff]  }
  0x4f   :  { %1709 = vmatprep.subr.bf16.mxu0 %v1849_v38  ;;  %v1873_v38 = vld [vmem:[%s2468_s0 + $0x10] ss:$36 sps:$4 sm:$0xff]  }
  0x51   :  { %1004 = vmatmul.mubr.bf16.gmra.mrb[12].mxu0 %v1863_v45  ;;  %v1890_v45 = vld [vmem:[%s2470_s1 + $0x220] sm:$0xff]  }
  0x52   :  { %1710 = vmatpush3.bf16.msra.mxu0 %v1850_v39  ;;  %1093 = vmatprep.mubr.bf16.mxu0 %v1880_v53  ;;  %v1882_v39 = vld [vmem:[%s2468_s0 + $0x5c] ss:$36 sps:$4 sm:$0xff]  }
  0x53   :  { %1711 = vmatprep.subr.bf16.mxu0 %v1853_v40  ;;  %v1881_v40 = vld [vmem:[%s2470_s1 + $0x208] sm:$0xff]  }
  0x56   :  { %1712 = vmatpush3.bf16.msra.mxu0 %v1854_v41  ;;  %v1885_v41 = vld [vmem:[%s2470_s1 + $0x210] sm:$0xff]  }
  0x57   :  { %1713 = vmatprep.subr.bf16.mxu0 %v1857_v42  ;;  %v1884_v42 = vld [vmem:[%s2468_s0 + $0x58] ss:$36 sps:$4 sm:$0xff]  }
  0x5a   :  { %1714 = vmatpush3.bf16.msra.mxu0 %v1858_v43  ;;  %v1892_v43 = vld [vmem:[%s2468_s0 + $0x20] ss:$36 sps:$4 sm:$0xff]  }
  0x5b   :  { %1715 = vmatprep.subr.bf16.mxu0 %v1864_v46  ;;  %v1891_v46 = vld [vmem:[%s2470_s1 + $0x228] sm:$0xff]  }
  0x5e   :  { %1716 = vmatpush3.bf16.msra.mxu0 %v1865_v47  ;;  %v1893_v47 = vld [vmem:[%s2468_s0 + $0x68] ss:$36 sps:$4 sm:$0xff]  }
  0x5f   :  { %1717 = vmatprep.subr.bf16.mxu0 %v1868_v48 }
  0x62   :  { %1718 = vmatpush3.bf16.msra.mxu0 %v1869_v49 }
  0x63   :  { %1719 = vmatprep.subr.bf16.mxu0 %v1872_v50 }
  0x66   :  { %1720 = vmatpush3.bf16.msra.mxu0 %v1876_v51 }
  0x69   :  { %1094 = vmatmul.mubr.bf16.vlgmr.msra.gmra.mrb[16].mxu0 %v1878_v52 }
  0x6a   :  { %1101 = vmatprep.mubr.bf16.mxu0 %v1886_v54 }
  0x71   :  { %1102 = vmatmul.mubr.bf16.gmra.mrb[20].mxu0 %v1888_v55 }
  0x72   :  { %1425 = vmatprep.mubr.bf16.mxu0 %v1922_v0 }
  0xfc   :  { %v329_v56 = vpop.f32.mrb[0].mxu0 }
  0xfd   :  { %v331_v57 = vpop.f32.mrb[1].mxu0 }
  0xfe   :  { %v332_v58 = vpop.f32.mrb[2].mxu0 }
  0xff   :  { %v348_v59 = vpack.c.bf16 %v332_v58, %v329_v56  ;;  %v334_v60 = vpop.f32.mrb[3].mxu0 }
 0x100   :  { %v1896_v60 = vld [vmem:[%s2471_s6 + $0x4] ss:$8 sps:$4 sm:$0xff]  }
 0x101   :  { %1741 = vmatprep.subr.bf16.mxu1 %v348_v59 }
 0x102   :  { %1742 = vmatpush3.bf16.msra.mxu1 %v348_v59 }
 0x104   :  { %v337_v61 = vpop.f32.mrb[4].mxu0 }
 0x105   :  { %v339_v62 = vpop.f32.mrb[5].mxu0 }
 0x106   :  { %v340_v63 = vpop.f32.mrb[6].mxu0 }
 0x107   :  { %v349_v1 = vpack.c.bf16 %v340_v63, %v337_v61  ;;  %v342_v2 = vpop.f32.mrb[7].mxu0  ;;  %v1894_v61 = vld [vmem:[%s2471_s6] ss:$8 sps:$4 sm:$0xff]  }
 0x109   :  { %1743 = vmatprep.subr.bf16.mxu1 %v349_v1 }
 0x10a   :  { %1744 = vmatpush3.bf16.msra.mxu1 %v349_v1  ;;  %v1899_v1 = vld [vmem:[%s2471_s6 + $0x14] ss:$8 sps:$4 sm:$0xff]  }
 0x10b   :  { %1621 = vmatprep.subr.bf16.mxu1 %v1803_v3 }
 0x10d   :  { %1746 = vmatmul.mubr.msk.bf16.vlgmr.msra.gmra.mrb[0].mxu1 %vm288_vm0, %v1805_v4  ;;  %v1897_v4 = vld [vmem:[%s2471_s6 + $0x10] ss:$8 sps:$4 sm:$0xff]  }
 0x10e   :  { %1622 = vmatpush3.bf16.msra.mxu1 %v1806_v6  ;;  %946 = vmatprep.mubr.bf16.mxu1 %v1987_v5  ;;  %v1818_v5 = vld [vmem:[%s2470_s1 + $0x18] sm:$0xff]  }
 0x10f   :  { %1623 = vmatprep.subr.bf16.mxu1 %v1808_v7 }
 0x112   :  { %1624 = vmatpush3.bf16.msra.mxu1 %v1810_v8  ;;  %v1902_v8 = vld [vmem:[%s2471_s6 + $0x24] ss:$8 sps:$4 sm:$0xff]  }
 0x113   :  { %1625 = vmatprep.subr.bf16.mxu1 %v1812_v9  ;;  %v1900_v9 = vld [vmem:[%s2471_s6 + $0x20] ss:$8 sps:$4 sm:$0xff]  }
 0x116   :  { %1626 = vmatpush3.bf16.msra.mxu1 %v1814_v10 }
 0x117   :  { %1627 = vmatprep.subr.bf16.mxu1 %v1816_v11  ;;  %v1903_v11 = vld [vmem:[%s2471_s6 + $0x30] ss:$8 sps:$4 sm:$0xff]  }
 0x11a   :  { %1628 = vmatpush3.bf16.msra.mxu1 %v1818_v5  ;;  %v1905_v5 = vld [vmem:[%s2471_s6 + $0x34] ss:$8 sps:$4 sm:$0xff]  }
 0x11b   :  { %1629 = vmatprep.subr.bf16.mxu1 %v1820_v15 }
 0x11c   :  { %v1665_v48 = vpop.f32.mrb[8].mxu0 }
 0x11d   :  { %v1666_v49 = vpop.f32.mrb[9].mxu0 }
 0x11e   :  { %1630 = vmatpush3.bf16.msra.mxu1 %v1822_v16  ;;  %v1667_v50 = vadd.f32 %v1666_v49, %v1665_v48  ;;  %v1668_v51 = vpop.f32.mrb[10].mxu0  ;;  %v1908_v16 = vld [vmem:[%s2471_s6 + $0x44] ss:$8 sps:$4 sm:$0xff]  }
 0x11f   :  { %1631 = vmatprep.subr.bf16.mxu1 %v1824_v17  ;;  %v1669_v52 = vpop.f32.mrb[11].mxu0 }
 0x120   :  { %v1670_v53 = vadd.f32 %v1669_v52, %v1668_v51 }
 0x122   :  { %1632 = vmatpush3.bf16.msra.mxu1 %v1826_v18 }
 0x123   :  { %1633 = vmatprep.subr.bf16.mxu1 %v1828_v19 }
 0x124   :  { %v1671_v54 = vpop.f32.mrb[12].mxu0 }
 0x125   :  { %v1672_v55 = vpop.f32.mrb[13].mxu0 }
 0x126   :  { %1634 = vmatpush3.bf16.msra.mxu1 %v1830_v20  ;;  %v1673_v56 = vadd.f32 %v1672_v55, %v1671_v54  ;;  %v1674_v57 = vpop.f32.mrb[14].mxu0 }
 0x127   :  { %1635 = vmatprep.subr.bf16.mxu1 %v1832_v21  ;;  %v1675_v58 = vpop.f32.mrb[15].mxu0  ;;  %v1906_v21 = vld [vmem:[%s2471_s6 + $0x40] ss:$8 sps:$4 sm:$0xff]  }
 0x128   :  { %v1676_v59 = vadd.f32 %v1675_v58, %v1674_v57 }
 0x12a   :  { %1636 = vmatpush3.bf16.msra.mxu1 %v1834_v22  ;;  %v1911_v22 = vld [vmem:[%s2471_s6 + $0x54] ss:$8 sps:$4 sm:$0xff]  }
 0x12b   :  { %1677 = vmatprep.subr.bf16.mxu1 %v1839_v23  ;;  %v1909_v23 = vld [vmem:[%s2471_s6 + $0x50] ss:$8 sps:$4 sm:$0xff]  }
 0x12d   :  { %947 = vmatmul.mubr.bf16.vlgmr.msra.gmra.mrb[4].mxu1 %v2018_v12  ;;  %v1875_v12 = vld [vmem:[%s2468_s0 + $0x14] ss:$36 sps:$4 sm:$0xff]  }
 0x12e   :  { %1678 = vmatpush3.bf16.msra.mxu1 %v1840_v24  ;;  %954 = vmatprep.mubr.bf16.mxu1 %v2023_v13  ;;  %v1852_v13 = vld [vmem:[%s2470_s1 + $0x118] sm:$0xff]   ;;  %v1914_v24 = vld [vmem:[%s2471_s6 + $0x64] ss:$8 sps:$4 sm:$0xff]  }
 0x12f   :  { %1679 = vmatprep.subr.bf16.mxu1 %v1843_v25  ;;  %v1912_v25 = vld [vmem:[%s2471_s6 + $0x60] ss:$8 sps:$4 sm:$0xff]  }
 0x132   :  { %1680 = vmatpush3.bf16.msra.mxu1 %v1844_v26  ;;  %v1917_v26 = vld [vmem:[%s2471_s6 + $0x74] ss:$8 sps:$4 sm:$0xff]  }
 0x133   :  { %1681 = vmatprep.subr.bf16.mxu1 %v1847_v27  ;;  %v1915_v27 = vld [vmem:[%s2471_s6 + $0x70] ss:$8 sps:$4 sm:$0xff]  }
 0x135   :  { %955 = vmatmul.mubr.bf16.gmra.mrb[8].mxu1 %v2031_v14  ;;  %v1859_v14 = vld [vmem:[%s2470_s1 + $0x168] sm:$0xff]  }
 0x136   :  { %1682 = vmatpush3.bf16.msra.mxu1 %v1848_v28  ;;  %1044 = vmatprep.mubr.bf16.mxu1 %v1875_v12 }
 0x137   :  { %1683 = vmatprep.subr.bf16.mxu1 %v1851_v29 }
 0x13a   :  { %1684 = vmatpush3.bf16.msra.mxu1 %v1852_v13 }
 0x13b   :  { %1685 = vmatprep.subr.bf16.mxu1 %v1855_v30 }
 0x13c   :  { %v1721_v62 = vpop.f32.mrb[16].mxu0 }
 0x13d   :  { %v1722_v63 = vpop.f32.mrb[17].mxu0 }
 0x13e   :  { %1686 = vmatpush3.bf16.msra.mxu1 %v1856_v31  ;;  %v1723_v2 = vadd.f32 %v1722_v63, %v1721_v62  ;;  %v1724_v3 = vpop.f32.mrb[18].mxu0  ;;  %v1592_v62 = vld [vmem:[%s2472_s4] ss:$0 sm:$0xff] }
 0x13f   :  { %1687 = vmatprep.subr.bf16.mxu1 %v1859_v14  ;;  %v1725_v6 = vpop.f32.mrb[19].mxu0 }
 0x140   :  { %v1726_v7 = vadd.f32 %v1725_v6, %v1724_v3 }
 0x142   :  { %1688 = vmatpush3.bf16.msra.mxu1 %v1862_v32 }
 0x143   :  { %1689 = vmatprep.subr.bf16.mxu1 %v1866_v33 }
 0x144   :  { %v1727_v10 = vpop.f32.mrb[20].mxu0 }
 0x145   :  { %v1728_v15 = vpop.f32.mrb[21].mxu0 }
 0x146   :  { %1690 = vmatpush3.bf16.msra.mxu1 %v1867_v34  ;;  %v1729_v17 = vadd.f32 %v1728_v15, %v1727_v10  ;;  %v1730_v18 = vpop.f32.mrb[22].mxu0 }
 0x147   :  { %1691 = vmatprep.subr.bf16.mxu1 %v1870_v35  ;;  %v1731_v19 = vpop.f32.mrb[23].mxu0 }
 0x148   :  { %v1732_v20 = vadd.f32 %v1731_v19, %v1730_v18 }
 0x14a   :  { %1692 = vmatpush3.bf16.msra.mxu1 %v1871_v36 }
 0x14b   :  { %1749 = vmatprep.subr.bf16.mxu1 %v1877_v37 }
 0x14d   :  { %1045 = vmatmul.mubr.bf16.vlgmr.msra.gmra.mrb[12].mxu1 %v1873_v38 }
 0x14e   :  { %1750 = vmatpush3.bf16.msra.mxu1 %v1877_v37  ;;  %1052 = vmatprep.mubr.bf16.mxu1 %v1882_v39 }
 0x14f   :  { %1751 = vmatprep.subr.bf16.mxu1 %v1881_v40 }
 0x152   :  { %1752 = vmatpush3.bf16.msra.mxu1 %v1881_v40 }
 0x153   :  { %1753 = vmatprep.subr.bf16.mxu1 %v1885_v41 }
 0x155   :  { %1053 = vmatmul.mubr.bf16.gmra.mrb[16].mxu1 %v1884_v42 }
 0x156   :  { %1754 = vmatpush3.bf16.msra.mxu1 %v1885_v41  ;;  %1761 = vmatprep.mubr.msk.bf16.mxu1 %vm907_vm1, %v1892_v43 }
 0x157   :  { %1755 = vmatprep.subr.bf16.mxu1 %v1889_v44 }
 0x15a   :  { %1756 = vmatpush3.bf16.msra.mxu1 %v1889_v44 }
 0x15b   :  { %1757 = vmatprep.subr.bf16.mxu1 %v1890_v45 }
 0x15e   :  { %1758 = vmatpush3.bf16.msra.mxu1 %v1890_v45 }
 0x15f   :  { %1759 = vmatprep.subr.bf16.mxu1 %v1891_v46 }
 0x162   :  { %1760 = vmatpush3.bf16.msra.mxu1 %v1891_v46 }
 0x163   :  { %1280 = vmatprep.subr.bf16.mxu1 %v1896_v60 }
 0x165   :  { %1762 = vmatmul.mubr.msk.bf16.vlgmr.msra.gmra.mrb[0].mxu1 %vm907_vm1, %v1893_v47 }
 0x166   :  { %1312 = vmatprep.mubr.bf16.mxu1 %v1922_v0  ;;  %1281 = vmatpush1.bf16.msra.mxu1 %v1894_v61 }
 0x167   :  { %1282 = vmatprep.subr.bf16.mxu1 %v1899_v1 }
 0x16a   :  { %1283 = vmatpush1.bf16.msra.mxu1 %v1897_v4 }
 0x16b   :  { %1284 = vmatprep.subr.bf16.mxu1 %v1902_v8 }
 0x16e   :  { %1285 = vmatpush1.bf16.msra.mxu1 %v1900_v9 }
 0x16f   :  { %1286 = vmatprep.subr.bf16.mxu1 %v1905_v5 }
 0x172   :  { %1287 = vmatpush1.bf16.msra.mxu1 %v1903_v11 }
 0x173   :  { %1288 = vmatprep.subr.bf16.mxu1 %v1908_v16 }
 0x176   :  { %1289 = vmatpush1.bf16.msra.mxu1 %v1906_v21 }
 0x177   :  { %1290 = vmatprep.subr.bf16.mxu1 %v1911_v22 }
 0x17a   :  { %1291 = vmatpush1.bf16.msra.mxu1 %v1909_v23 }
 0x17b   :  { %1292 = vmatprep.subr.bf16.mxu1 %v1914_v24 }
 0x17e   :  { %1293 = vmatpush1.bf16.msra.mxu1 %v1912_v25 }
 0x17f   :  { %1294 = vmatprep.subr.bf16.mxu1 %v1917_v26 }
 0x182   :  { %1295 = vmatpush1.bf16.msra.mxu1 %v1915_v27 }
 0x200   :  { %v1637_v28 = vpop.f32.mrb[4].mxu1 }
 0x201   :  { %v1638_v12 = vpop.f32.mrb[5].mxu1 }
 0x202   :  { %v1639_v29 = vadd.f32 %v1638_v12, %v1637_v28  ;;  %v1640_v13 = vpop.f32.mrb[6].mxu1 }
 0x203   :  { %v1641_v30 = vpop.f32.mrb[7].mxu1 }
 0x204   :  { %v1769_v31 = vadd.f32 %v1667_v50, %v1639_v29  ;;  %v1642_v14 = vadd.f32 %v1641_v30, %v1640_v13 }
 0x206   :  { %v1777_v32 = vadd.f32 %v1670_v53, %v1642_v14 }
 0x208   :  { %v1643_v33 = vpop.f32.mrb[8].mxu1 }
 0x209   :  { %v1644_v34 = vpop.f32.mrb[9].mxu1 }
 0x20a   :  { %v1645_v35 = vadd.f32 %v1644_v34, %v1643_v33  ;;  %v1646_v36 = vpop.f32.mrb[10].mxu1  ;;  %v1918_v33 = vld [vmem:[%s2473_s5] sm:$0xff]   ;;  %v1919_v34 = vld [vmem:[%s2473_s5 + $0x8] sm:$0xff]  }
 0x20b   :  { %v1647_v37 = vpop.f32.mrb[11].mxu1 }
 0x20c   :  { %v1765_v38 = vadd.f32 %v1673_v56, %v1645_v35  ;;  %v1648_v39 = vadd.f32 %v1647_v37, %v1646_v36  ;;  %v1920_v35 = vld [vmem:[%s2473_s5 + $0x10] sm:$0xff]   ;;  %v1921_v36 = vld [vmem:[%s2473_s5 + $0x18] sm:$0xff]   ;;  %v1345_v37 = vld [vmem:[%s2474_s7] sm:$0xff] }
 0x20e   :  { %v1773_v40 = vadd.f32 %v1676_v59, %v1648_v39 }
 0x220   :  { %v1693_v41 = vpop.f32.mrb[12].mxu1 }
 0x221   :  { %v1694_v42 = vpop.f32.mrb[13].mxu1 }
 0x222   :  { %v1695_v43 = vadd.f32 %v1694_v42, %v1693_v41  ;;  %v1696_v44 = vpop.f32.mrb[14].mxu1  ;;  %v1348_v42 = vld [vmem:[%s2474_s7 + $0x18] sm:$0xff] }
 0x223   :  { %v1697_v45 = vpop.f32.mrb[15].mxu1 }
 0x224   :  { %v1770_v46 = vadd.f32 %v1769_v31, %v1695_v43  ;;  %v1698_v47 = vadd.f32 %v1697_v45, %v1696_v44 }
 0x226   :  { %v1778_v48 = vadd.f32 %v1777_v32, %v1698_v47  ;;  %v1771_v49 = vadd.f32 %v1770_v46, %v1723_v2 }
 0x228   :  { %v1699_v50 = vpop.f32.mrb[16].mxu1  ;;  %v1779_v51 = vadd.f32 %v1778_v48, %v1726_v7  ;;  %v1349_v48 = vld [vmem:[%s2474_s7 + $0x20] sm:$0xff] }
 0x229   :  { %v1700_v52 = vpop.f32.mrb[17].mxu1 }
 0x22a   :  { %v1701_v53 = vadd.f32 %v1700_v52, %v1699_v50  ;;  %v1702_v54 = vpop.f32.mrb[18].mxu1 }
 0x22b   :  { %v1703_v55 = vpop.f32.mrb[19].mxu1 }
 0x22c   :  { %v1766_v57 = vadd.f32 %v1765_v38, %v1701_v53  ;;  %v1704_v58 = vadd.f32 %v1703_v55, %v1702_v54  ;;  %v1346_v38 = vld [vmem:[%s2474_s7 + $0x8] sm:$0xff]  ;;  %v1352_v54 = vld [vmem:[%s2474_s7 + $0x38] sm:$0xff] }
 0x22e   :  { %v1774_v56 = vadd.f32 %v1773_v40, %v1704_v58  ;;  %v1767_v60 = vadd.f32 %v1766_v57, %v1729_v17  ;;  %v1347_v40 = vld [vmem:[%s2474_s7 + $0x10] sm:$0xff] }
 0x230   :  { %v1775_v59 = vadd.f32 %v1774_v56, %v1732_v20 }
 0x238   :  { %v1763_v61 = vpop.f32.mrb[0].mxu1 }
 0x239   :  { %v1768_v63 = vadd.f32 %v1767_v60, %v1763_v61  ;;  %v1144_v1 = vpop.f32.mrb[1].mxu1  ;;  %v1354_v61 = vld [vmem:[%s2474_s7 + $0x48] sm:$0xff] }
 0x23a   :  { %v1772_v3 = vadd.f32 %v1771_v49, %v1144_v1  ;;  %v1764_v2 = vpop.f32.mrb[2].mxu1  ;;  %v1350_v49 = vld [vmem:[%s2474_s7 + $0x28] sm:$0xff] }
 0x23b   :  { %v1168_v4 = vadd.f32 %v1768_v63, %v1592_v62  ;;  %v1776_v6 = vadd.f32 %v1775_v59, %v1764_v2  ;;  %v1147_v7 = vpop.f32.mrb[3].mxu1  ;;  %v1353_v59 = vld [vmem:[%s2474_s7 + $0x40] sm:$0xff]  ;;  %v1355_v63 = vld [vmem:[%s2474_s7 + $0x50] sm:$0xff]  ;;  %v1356_v2 = vld [vmem:[%s2474_s7 + $0x58] sm:$0xff] }
 0x23c   :  { %v1166_v8 = vadd.f32 %v1772_v3, %v1592_v62  ;;  %v1780_v9 = vadd.f32 %v1779_v51, %v1147_v7  ;;  %v1351_v51 = vld [vmem:[%s2474_s7 + $0x30] sm:$0xff] }
 0x23d   :  { %v1176_v10 = vmul.f32 0.1, %v1168_v4  ;;  %v1169_v11 = vadd.f32 %v1776_v6, %v1592_v62  ;;  %vm1172_vm2 = vcmp.ge.f32.partialorder %v1168_v4, 0.0 }
 0x23e   :  { %v1174_v5 = vmul.f32 0.1, %v1166_v8  ;;  %v1167_v15 = vadd.f32 %v1780_v9, %v1592_v62  ;;  %vm1170_vm3 = vcmp.ge.f32.partialorder %v1166_v8, 0.0 }
 0x23f   :  { %vm1173_vm4 = vcmp.ge.f32.partialorder %v1169_v11, 0.0  ;;  %v1177_v16 = vmul.f32 0.1, %v1169_v11  ;;  %v1180_v18 = vsel %vm1172_vm2, %v1168_v4, %v1176_v10  ;;  %v1357_v10 = vld [vmem:[%s2474_s7 + $0x60] sm:$0xff] }
 0x240   :  { %vm1171_vm5 = vcmp.ge.f32.partialorder %v1167_v15, 0.0  ;;  %v1175_v17 = vmul.f32 0.1, %v1167_v15  ;;  %v1178_v20 = vsel %vm1170_vm3, %v1166_v8, %v1174_v5 }
 0x241   :  { %v1181_v19 = vsel %vm1173_vm4, %v1169_v11, %v1177_v16  ;;  %v1358_v11 = vld [vmem:[%s2474_s7 + $0x68] sm:$0xff] }
 0x242   :  { %v1179_v21 = vsel %vm1171_vm5, %v1167_v15, %v1175_v17  ;;  %v1183_v22 = vpack.c.bf16 %v1181_v19, %v1180_v18  ;;  %v1359_v15 = vld [vmem:[%s2474_s7 + $0x70] sm:$0xff]  ;;  %v1360_v18 = vld [vmem:[%s2474_s7 + $0x78] sm:$0xff] }
 0x243   :  { %v1182_v23 = vpack.c.bf16 %v1179_v21, %v1178_v20 }
 0x245   :  { %1313 = vmatmul.mubr.bf16.vlgmr.msra.gmra.mrb[20].mxu1 %v1182_v23 }
 0x246   :  { %1322 = vmatprep.mubr.bf16.mxu1 %v1922_v0 }
 0x24d   :  { %1323 = vmatmul.mubr.bf16.gmra.mrb[24].mxu1 %v1183_v22 }
 0x318   :  { %v1314_v24 = vpop.f32.mrb[20].mxu1 }
 0x319   :  { %v1316_v25 = vpop.f32.mrb[21].mxu1 }
 0x31a   :  { %v1318_v26 = vpop.f32.mrb[22].mxu1 }
 0x31b   :  { %v1341_v27 = vpack.c.bf16 %v1318_v26, %v1314_v24  ;;  %v1320_v28 = vpop.f32.mrb[23].mxu1 }
 0x31c   :  { %v1342_v12 = vpack.c.bf16 %v1320_v28, %v1316_v25 }
 0x31e   :  { %1393 = vmatprep.subr.bf16.mxu0 %v1342_v12 }
 0x31f   :  { %1394 = vmatpush1.bf16.msra.mxu0 %v1341_v27 }
 0x320   :  { %v1324_v29 = vpop.f32.mrb[24].mxu1 }
 0x321   :  { %v1326_v13 = vpop.f32.mrb[25].mxu1 }
 0x322   :  { %v1328_v30 = vpop.f32.mrb[26].mxu1 }
 0x323   :  { %v1343_v31 = vpack.c.bf16 %v1328_v30, %v1324_v29  ;;  %v1330_v14 = vpop.f32.mrb[27].mxu1 }
 0x324   :  { %v1344_v32 = vpack.c.bf16 %v1330_v14, %v1326_v13 }
 0x326   :  { %1395 = vmatprep.subr.bf16.mxu0 %v1344_v32 }
 0x327   :  { %1396 = vmatpush1.bf16.msra.mxu0 %v1343_v31 }
 0x32a   :  { %1613 = vmatmul.mubr.msk.bf16.vlgmr.msra.gmra.mrb[24].mxu0 %vm288_vm0, %v1918_v33 }
 0x32b   :  { %1435 = vmatprep.mubr.bf16.mxu0 %v1922_v0 }
 0x332   :  { %1614 = vmatmul.mubr.msk.bf16.gmra.mrb[28].mxu0 %vm288_vm0, %v1919_v34 }
 0x333   :  { %1445 = vmatprep.mubr.bf16.mxu0 %v1922_v0 }
 0x33a   :  { %1615 = vmatmul.mubr.msk.bf16.gmra.mrb[32].mxu0 %vm288_vm0, %v1920_v35 }
 0x33b   :  { %1455 = vmatprep.mubr.bf16.mxu0 %v1922_v0 }
 0x342   :  { %1616 = vmatmul.mubr.msk.bf16.gmra.mrb[36].mxu0 %vm288_vm0, %v1921_v36 }
 0x3fd   :  { %v1427_v39 = vpop.f32.mrb[24].mxu0 }
 0x3fe   :  { %v1428_v0 = vadd.f32 %v1427_v39, %v1345_v37  ;;  %v1429_v41 = vpop.f32.mrb[25].mxu0 }
 0x3ff   :  { %v1430_v43 = vadd.f32 %v1429_v41, %v1346_v38  ;;  %v1431_v44 = vpop.f32.mrb[26].mxu0 }
 0x400   :  { %1466 = vst [vmem:[%s2475_s8] sm:$0xff] %v1428_v0  ;;  %v1432_v45 = vadd.f32 %v1431_v44, %v1347_v40  ;;  %v1433_v46 = vpop.f32.mrb[27].mxu0 }
 0x401   :  { %1467 = vst [vmem:[%s2475_s8 + $0x8] sm:$0xff] %v1430_v43  ;;  %v1434_v47 = vadd.f32 %v1433_v46, %v1348_v42 }
 0x402   :  { %1468 = vst [vmem:[%s2475_s8 + $0x10] sm:$0xff] %v1432_v45 }
 0x403   :  { %1469 = vst [vmem:[%s2475_s8 + $0x18] sm:$0xff] %v1434_v47 }
 0x405   :  { %v1437_v50 = vpop.f32.mrb[28].mxu0 }
 0x406   :  { %v1438_v52 = vadd.f32 %v1437_v50, %v1349_v48  ;;  %v1439_v53 = vpop.f32.mrb[29].mxu0 }
 0x407   :  { %v1440_v55 = vadd.f32 %v1439_v53, %v1350_v49  ;;  %v1441_v57 = vpop.f32.mrb[30].mxu0 }
 0x408   :  { %1470 = vst [vmem:[%s2475_s8 + $0x20] sm:$0xff] %v1438_v52  ;;  %v1442_v58 = vadd.f32 %v1441_v57, %v1351_v51  ;;  %v1443_v56 = vpop.f32.mrb[31].mxu0 }
 0x409   :  { %1471 = vst [vmem:[%s2475_s8 + $0x28] sm:$0xff] %v1440_v55  ;;  %v1444_v60 = vadd.f32 %v1443_v56, %v1352_v54 }
 0x40a   :  { %1472 = vst [vmem:[%s2475_s8 + $0x30] sm:$0xff] %v1442_v58 }
 0x40b   :  { %1473 = vst [vmem:[%s2475_s8 + $0x38] sm:$0xff] %v1444_v60 }
 0x40d   :  { %v1447_v62 = vpop.f32.mrb[32].mxu0 }
 0x40e   :  { %v1448_v1 = vadd.f32 %v1447_v62, %v1353_v59  ;;  %v1449_v3 = vpop.f32.mrb[33].mxu0 }
 0x40f   :  { %v1450_v4 = vadd.f32 %v1449_v3, %v1354_v61  ;;  %v1451_v6 = vpop.f32.mrb[34].mxu0 }
 0x410   :  { %1474 = vst [vmem:[%s2475_s8 + $0x40] sm:$0xff] %v1448_v1  ;;  %v1452_v7 = vadd.f32 %v1451_v6, %v1355_v63  ;;  %v1453_v8 = vpop.f32.mrb[35].mxu0 }
 0x411   :  { %1475 = vst [vmem:[%s2475_s8 + $0x48] sm:$0xff] %v1450_v4  ;;  %v1454_v9 = vadd.f32 %v1453_v8, %v1356_v2 }
 0x412   :  { %1476 = vst [vmem:[%s2475_s8 + $0x50] sm:$0xff] %v1452_v7 }
 0x413   :  { %1477 = vst [vmem:[%s2475_s8 + $0x58] sm:$0xff] %v1454_v9 }
 0x415   :  { %v1457_v5 = vpop.f32.mrb[36].mxu0 }
 0x416   :  { %v1458_v16 = vadd.f32 %v1457_v5, %v1357_v10  ;;  %v1459_v17 = vpop.f32.mrb[37].mxu0 }
 0x417   :  { %v1460_v19 = vadd.f32 %v1459_v17, %v1358_v11  ;;  %v1461_v20 = vpop.f32.mrb[38].mxu0 }
 0x418   :  { %1478 = vst [vmem:[%s2475_s8 + $0x60] sm:$0xff] %v1458_v16  ;;  %v1462_v21 = vadd.f32 %v1461_v20, %v1359_v15  ;;  %v1463_v22 = vpop.f32.mrb[39].mxu0 }
 0x419   :  { %1479 = vst [vmem:[%s2475_s8 + $0x68] sm:$0xff] %v1460_v19  ;;  %v1464_v23 = vadd.f32 %v1463_v22, %v1360_v18 }
 0x41a   :  { %1480 = vst [vmem:[%s2475_s8 + $0x70] sm:$0xff] %v1462_v21 }
 0x41b   :  { %1481 = vst [vmem:[%s2475_s8 + $0x78] sm:$0xff] %v1464_v23 }

</bundles_post_ra>
